<compile_context>
chip_gen: v5e
topology: v5e:2x2
jax: 0.10.0
libtpu: 0.0.40
codegen_flags: <defaults>
</compile_context>

<pallas_src>
import jax
import jax.numpy as jnp
from jax.experimental import pallas as pl
from jax.experimental.pallas import tpu as pltpu


def _adain_pp_kernel(x_ref, scale_ref, bias_ref, mscale_ref, o_ref):
    # x: (Nb, C, HW); affine params: (Nb, C, 1)   -- all static shapes
    x = x_ref[...].astype(jnp.float32)           # stats in f32 even if bf16 in
    _, C, HW = x.shape

    scale = scale_ref[...]                       # (Nb, C, 1)
    bias = bias_ref[...]                         # (Nb, C, 1)
    mean_scale = mscale_ref[...]                 # (Nb, C, 1)

    # Per-channel instance statistics (torch.std default is unbiased /(HW-1)).
    mean = jnp.mean(x, axis=-1, keepdims=True)   # (Nb, C, 1)
    xc = x - mean                                # computed once; reused below
    var = jnp.sum(xc * xc, axis=-1, keepdims=True) / (HW - 1)
    std = jnp.sqrt(var)                          # (Nb, C, 1)

    # Cross-channel stats of the per-channel means (unbiased /(C-1)).
    mean_mean = jnp.mean(mean, axis=1, keepdims=True)            # (Nb, 1, 1)
    dm = mean - mean_mean                                        # (Nb, C, 1)
    mean_std = jnp.sqrt(jnp.sum(dm * dm, axis=1, keepdims=True) / (C - 1))

    # Fold everything into per-channel coefficients; exact divides are cheap
    # on (Nb, C, 1) and keep us within 1e-4 of the PyTorch reference.
    a = scale / (std + 1e-6)                                     # (Nb, C, 1)
    b = bias + mean_scale * dm / (mean_std + 1e-6)               # (Nb, C, 1)

    # Single fused multiply-add over the big tile.
    o_ref[...] = (xc * a + b).astype(o_ref.dtype)


def adaptive_instance_norm_pp(inputs, style, params, *,
                              block_budget_bytes=8 << 20):
    """inputs: (N, C, H, W), style: (N, A)."""
    N, C, H, W = inputs.shape
    HW = H * W

    # --- style -> per-channel affine params: one XLA matmul for all N ------
    w = jnp.concatenate(
        [params["scale_w"], params["bias_w"], params["mean_scale_w"]], axis=0)   # (3C, A)
    b = jnp.concatenate(
        [params["scale_b"], params["bias_b"], params["mean_scale_b"]], axis=0)   # (3C,)
    aff = style @ w.T + b                                                         # (N, 3C)
    scale = aff[:, 0 * C:1 * C].reshape(N, C, 1)
    bias = aff[:, 1 * C:2 * C].reshape(N, C, 1)
    mean_scale = aff[:, 2 * C:3 * C].reshape(N, C, 1)

    x = inputs.reshape(N, C, HW)

    # --- pick batch elements per grid step (amortize per-step overhead) ----
    itemsize = jnp.dtype(inputs.dtype).itemsize
    img_bytes = C * HW * itemsize
    nb = 1
    for cand in range(N, 0, -1):
        if N % cand == 0 and cand * img_bytes <= block_budget_bytes:
            nb = cand
            break
    # TODO(synk): for single images larger than the budget (e.g. C=512,
    # HW=128*128 on v7x's 64 MiB VMEM) a two-phase stats-then-apply pipeline
    # over HW chunks would be required; not needed at these shapes.

    block_bytes = nb * img_bytes
    # ~2x double-buffered input + 2x output blocks + small affine refs + headroom.
    vmem_limit = int(min(64 << 20, max(16 << 20, 4 * block_bytes + (4 << 20))))

    out = pl.pallas_call(
        _adain_pp_kernel,
        out_shape=jax.ShapeDtypeStruct((N, C, HW), inputs.dtype),
        grid_spec=pltpu.PrefetchScalarGridSpec(
            num_scalar_prefetch=0,
            grid=(N // nb,),
            in_specs=[
                pl.BlockSpec((nb, C, HW), lambda i: (i, 0, 0)),   # images
                pl.BlockSpec((nb, C, 1), lambda i: (i, 0, 0)),    # scale
                pl.BlockSpec((nb, C, 1), lambda i: (i, 0, 0)),    # bias
                pl.BlockSpec((nb, C, 1), lambda i: (i, 0, 0)),    # mean_scale
            ],
            out_specs=pl.BlockSpec((nb, C, HW), lambda i: (i, 0, 0)),
        ),
        compiler_params=pltpu.CompilerParams(
            dimension_semantics=("parallel",),
            vmem_limit_bytes=vmem_limit),
    )(x, scale, bias, mean_scale)
    return out.reshape(N, C, H, W)


def ref_forward(inputs, style, params):
    """Pure-JAX reference matching the PyTorch module exactly."""
    N, C, H, W = inputs.shape
    xf = inputs.reshape(N, C, -1)
    mean = xf.mean(-1)                                                # (N, C)
    std = jnp.sqrt(jnp.sum((xf - mean[..., None]) ** 2, -1) / (H * W - 1))
    mean_mean = mean.mean(1, keepdims=True)                           # (N, 1)
    mean_std = jnp.std(mean, axis=1, keepdims=True, ddof=1)           # (N, 1)

    scale = style @ params["scale_w"].T + params["scale_b"]
    bias = style @ params["bias_w"].T + params["bias_b"]
    mean_scale = style @ params["mean_scale_w"].T + params["mean_scale_b"]

    result = (scale[..., None, None] * (inputs - mean[..., None, None])
              / (std[..., None, None] + 1e-6) + bias[..., None, None])
    correction = mean_scale * (mean - mean_mean) / (mean_std + 1e-6)
    return result + correction[..., None, None]


if __name__ == "__main__":
    N, C, H, W, A = 2, 4, 16, 16, 8

    key = jax.random.PRNGKey(0)
    k = jax.random.split(key, 8)
    bound = 1.0 / (A ** 0.5)   # nn.Linear default init bound

    x = jax.random.normal(k[0], (N, C, H, W), jnp.float32)
    style = jax.random.normal(k[1], (N, A), jnp.float32)
    params = {
        "scale_w": jax.random.uniform(k[2], (C, A), jnp.float32, -bound, bound),
        "scale_b": jax.random.uniform(k[3], (C,), jnp.float32, -bound, bound),
        "bias_w": jax.random.uniform(k[4], (C, A), jnp.float32, -bound, bound),
        "bias_b": jax.random.uniform(k[5], (C,), jnp.float32, -bound, bound),
        "mean_scale_w": jax.random.uniform(k[6], (C, A), jnp.float32, -bound, bound),
        "mean_scale_b": jax.random.uniform(k[7], (C,), jnp.float32, -bound, bound),
    }

    out = adaptive_instance_norm_pp(x, style, params)
    out = jax.block_until_ready(out)

    ref = ref_forward(x, style, params)
    assert out.shape == (N, C, H, W)
    assert jnp.allclose(out, ref, atol=1e-4, rtol=1e-4), "mismatch vs reference"

    print("KERNEL_OK")
</pallas_src>

<mosaic_0001>
module attributes {stable_mosaic.version = 11 : i64} {
  func.func @_adain_pp_kernel(%arg0: i32, %arg1: memref<2x4x256xf32, #tpu.memory_space<vmem>>, %arg2: memref<2x4x1xf32, #tpu.memory_space<vmem>>, %arg3: memref<2x4x1xf32, #tpu.memory_space<vmem>>, %arg4: memref<2x4x1xf32, #tpu.memory_space<vmem>>, %arg5: memref<2x4x256xf32, #tpu.memory_space<vmem>>) attributes {dimension_semantics = [#tpu.dimension_semantics<parallel>], iteration_bounds = array<i64: 1>, scalar_prefetch = 0 : i64, scratch_operands = 0 : i64, tpu.core_type = #tpu.core_type<tc>, window_params = [{transform_indices = @transform_0, window_bounds = array<i64: 2, 4, 256>}, {transform_indices = @transform_1, window_bounds = array<i64: 2, 4, 1>}, {transform_indices = @transform_2, window_bounds = array<i64: 2, 4, 1>}, {transform_indices = @transform_3, window_bounds = array<i64: 2, 4, 1>}, {transform_indices = @transform_4, window_bounds = array<i64: 2, 4, 256>}]} {
    %c0 = arith.constant 0 : index
    %c0_0 = arith.constant 0 : index
    %c0_1 = arith.constant 0 : index
    %0 = vector.load %arg1[%c0, %c0_0, %c0_1] : memref<2x4x256xf32, #tpu.memory_space<vmem>>, vector<2x4x256xf32>
    %c0_2 = arith.constant 0 : index
    %c0_3 = arith.constant 0 : index
    %c0_4 = arith.constant 0 : index
    %1 = vector.load %arg2[%c0_2, %c0_3, %c0_4] : memref<2x4x1xf32, #tpu.memory_space<vmem>>, vector<2x4x1xf32>
    %c0_5 = arith.constant 0 : index
    %c0_6 = arith.constant 0 : index
    %c0_7 = arith.constant 0 : index
    %2 = vector.load %arg3[%c0_5, %c0_6, %c0_7] : memref<2x4x1xf32, #tpu.memory_space<vmem>>, vector<2x4x1xf32>
    %c0_8 = arith.constant 0 : index
    %c0_9 = arith.constant 0 : index
    %c0_10 = arith.constant 0 : index
    %3 = vector.load %arg4[%c0_8, %c0_9, %c0_10] : memref<2x4x1xf32, #tpu.memory_space<vmem>>, vector<2x4x1xf32>
    %cst = arith.constant dense<0.000000e+00> : vector<2x4xf32>
    %4 = vector.multi_reduction <add>, %0, %cst [2] : vector<2x4x256xf32> to vector<2x4xf32>
    %5 = vector.shape_cast %4 : vector<2x4xf32> to vector<2x4x1xf32>
    %cst_11 = arith.constant 2.560000e+02 : f32
    %6 = vector.broadcast %cst_11 : f32 to vector<2x4x1xf32>
    %7 = arith.divf %5, %6 : vector<2x4x1xf32>
    %8 = vector.broadcast %7 : vector<2x4x1xf32> to vector<2x4x256xf32>
    %9 = arith.subf %0, %8 : vector<2x4x256xf32>
    %10 = arith.mulf %9, %9 : vector<2x4x256xf32>
    %cst_12 = arith.constant dense<0.000000e+00> : vector<2x4xf32>
    %11 = vector.multi_reduction <add>, %10, %cst_12 [2] : vector<2x4x256xf32> to vector<2x4xf32>
    %12 = vector.shape_cast %11 : vector<2x4xf32> to vector<2x4x1xf32>
    %cst_13 = arith.constant 2.550000e+02 : f32
    %13 = vector.broadcast %cst_13 : f32 to vector<2x4x1xf32>
    %14 = arith.divf %12, %13 : vector<2x4x1xf32>
    %15 = math.sqrt %14 : vector<2x4x1xf32>
    %cst_14 = arith.constant dense<0.000000e+00> : vector<2x1xf32>
    %16 = vector.multi_reduction <add>, %7, %cst_14 [1] : vector<2x4x1xf32> to vector<2x1xf32>
    %17 = vector.shape_cast %16 : vector<2x1xf32> to vector<2x1x1xf32>
    %cst_15 = arith.constant 4.000000e+00 : f32
    %18 = vector.broadcast %cst_15 : f32 to vector<2x1x1xf32>
    %19 = arith.divf %17, %18 : vector<2x1x1xf32>
    %20 = vector.broadcast %19 : vector<2x1x1xf32> to vector<2x4x1xf32>
    %21 = arith.subf %7, %20 : vector<2x4x1xf32>
    %22 = arith.mulf %21, %21 : vector<2x4x1xf32>
    %cst_16 = arith.constant dense<0.000000e+00> : vector<2x1xf32>
    %23 = vector.multi_reduction <add>, %22, %cst_16 [1] : vector<2x4x1xf32> to vector<2x1xf32>
    %24 = vector.shape_cast %23 : vector<2x1xf32> to vector<2x1x1xf32>
    %cst_17 = arith.constant 3.000000e+00 : f32
    %25 = vector.broadcast %cst_17 : f32 to vector<2x1x1xf32>
    %26 = arith.divf %24, %25 : vector<2x1x1xf32>
    %27 = math.sqrt %26 : vector<2x1x1xf32>
    %cst_18 = arith.constant 9.99999997E-7 : f32
    %28 = vector.broadcast %cst_18 : f32 to vector<2x4x1xf32>
    %29 = arith.addf %15, %28 : vector<2x4x1xf32>
    %30 = arith.divf %1, %29 : vector<2x4x1xf32>
    %31 = arith.mulf %3, %21 : vector<2x4x1xf32>
    %cst_19 = arith.constant 9.99999997E-7 : f32
    %32 = vector.broadcast %cst_19 : f32 to vector<2x1x1xf32>
    %33 = arith.addf %27, %32 : vector<2x1x1xf32>
    %34 = vector.broadcast %33 : vector<2x1x1xf32> to vector<2x4x1xf32>
    %35 = arith.divf %31, %34 : vector<2x4x1xf32>
    %36 = arith.addf %2, %35 : vector<2x4x1xf32>
    %37 = vector.broadcast %30 : vector<2x4x1xf32> to vector<2x4x256xf32>
    %38 = arith.mulf %9, %37 : vector<2x4x256xf32>
    %39 = vector.broadcast %36 : vector<2x4x1xf32> to vector<2x4x256xf32>
    %40 = arith.addf %38, %39 : vector<2x4x256xf32>
    %c0_20 = arith.constant 0 : index
    %c0_21 = arith.constant 0 : index
    %c0_22 = arith.constant 0 : index
    %41 = vector.load %arg5[%c0_20, %c0_21, %c0_22] : memref<2x4x256xf32, #tpu.memory_space<vmem>>, vector<2x4x256xf32>
    tpu.vector_store %arg5[%c0_20, %c0_21, %c0_22], %40 {strides = array<i32>} : memref<2x4x256xf32, #tpu.memory_space<vmem>>, vector<2x4x256xf32>,
    return
  }
  func.func @transform_0(%arg0: i32) -> (i32, i32, i32) {
    %c0_i32 = arith.constant 0 : i32
    %c0_i32_0 = arith.constant 0 : i32
    %c0_i32_1 = arith.constant 0 : i32
    return %arg0, %c0_i32, %c0_i32_0 : i32, i32, i32
  }
  func.func @transform_1(%arg0: i32) -> (i32, i32, i32) {
    %c0_i32 = arith.constant 0 : i32
    %c0_i32_0 = arith.constant 0 : i32
    %c0_i32_1 = arith.constant 0 : i32
    return %arg0, %c0_i32, %c0_i32_0 : i32, i32, i32
  }
  func.func @transform_2(%arg0: i32) -> (i32, i32, i32) {
    %c0_i32 = arith.constant 0 : i32
    %c0_i32_0 = arith.constant 0 : i32
    %c0_i32_1 = arith.constant 0 : i32
    return %arg0, %c0_i32, %c0_i32_0 : i32, i32, i32
  }
  func.func @transform_3(%arg0: i32) -> (i32, i32, i32) {
    %c0_i32 = arith.constant 0 : i32
    %c0_i32_0 = arith.constant 0 : i32
    %c0_i32_1 = arith.constant 0 : i32
    return %arg0, %c0_i32, %c0_i32_0 : i32, i32, i32
  }
  func.func @transform_4(%arg0: i32) -> (i32, i32, i32) {
    %c0_i32 = arith.constant 0 : i32
    %c0_i32_0 = arith.constant 0 : i32
    %c0_i32_1 = arith.constant 0 : i32
    return %arg0, %c0_i32, %c0_i32_0 : i32, i32, i32
  }
}

</mosaic_0001>

<bundles_post_ra>
// kernel: tpu_custom_call.1
= control target key start
LH: loop header
LB: loop body
LE: loop exit
PB: predicated region body
PF: predicated region fallthrough
CT: control target
= control target key end

     0   :  { %s496_s0 = inlined_call_operand.vmem [shape: f32[2,4,256], index: 0, kind: input, shape index: {}]   ;;  %s497_s1 = inlined_call_operand.vmem [shape: f32[2,4,1], index: 1, kind: input, shape index: {}]   ;;  %s498_s2 = inlined_call_operand.vmem [shape: f32[2,4,1], index: 2, kind: input, shape index: {}]   ;;  %s499_s3 = inlined_call_operand.vmem [shape: f32[2,4,1], index: 3, kind: input, shape index: {}]   ;;  %s500_s4 = inlined_call_operand.hbm [shape: f32[2,4,256], index: 4, kind: output, shape index: {}]  }
   0x1   :  { %v18_v0 = vld [vmem:[%s496_s0] sm:$0xff]  ;;  %v19_v1 = vld [vmem:[%s496_s0 + $0x8] sm:$0xff] }
   0x2   :  { %28 = vst [vmem:[#allocation1] ss:$2 sm:$0xff] %v18_v0 }
   0x3   :  { %32 = vst [vmem:[#allocation1 + $0x10] ss:$2 sm:$0xff] %v19_v1 }
   0x4   :  { %9 = vsyncpa [#allocation3], 0  ;;  %vm39_vm0 = vcmask 1043456   ;;  %v395_v12 = vmov 256.0   ;;  %v396_v16 = vmov 4.0   ;;  %v398_v34 = vmov 3.0  }
   0x5   :  { %345 = vrcp.f32 %v395_v12  ;;  %v397_v20 = vmov 839922192   ;;  %v399_v50 = vmov 0   ;;  %s321_s5 = sshll.u32 %s500_s4, 4  ;;  %s402_s6 = smov 128   ;;  %s322_s5 = int_to_ptr.hbm [resolvable:$true] %s321_s5 }
   0x6   :  { %347 = vrcp.f32 %v396_v16  ;;  %v62_v21 = vunpack.c.l.s4 %v397_v20  ;;  %343 = vset.pattern.permute.xlu0 %v399_v50  ;;  %344 = vset.pattern.permute.xlu1 %v399_v50  ;;  %s403_s7 = smov 8  }
   0x7   :  { %349 = vrcp.f32 %v398_v34  ;;  %342 = vset.pattern.permute.xlu2 %v399_v50 }
   0x8   :  { %v439_v24 = vunpack.c.0.s8 %v62_v21 }
   0x9   :  { %v29_v2 = vld.sshfl [vmem:[#allocation1] sm:$0xff pattern:$0x75316420]  ;;  %v30_v3 = vld.sshfl [vmem:[#allocation1 + $0x8] sm:$0xff pattern:$0x75316420] }
   0xa   :  { %v40_v4 = vsel %vm39_vm0, %v29_v2, 0.0  ;;  %v41_v5 = vsel %vm39_vm0, %v30_v3, 0.0  ;;  %v33_v7 = vld.sshfl [vmem:[#allocation1 + $0x10] sm:$0xff pattern:$0x75316420] }
   0xb   :  { %v42_v6 = vadd.f32 %v41_v5, %v40_v4  ;;  %v34_v8 = vld.sshfl [vmem:[#allocation1 + $0x18] sm:$0xff pattern:$0x75316420]  ;;  %v45_v9 = vsel %vm39_vm0, %v33_v7, 0.0  ;;  %v346_v13 = vpop.eup %345 }
   0xc   :  { %v46_v10 = vsel %vm39_vm0, %v34_v8, 0.0  ;;  %v51_v14 = vmul.f32 256.0, %v346_v13  ;;  %v348_v18 = vpop.eup %347  ;;  %vm55_vm1 = vweird.f32 %v346_v13 }
   0xd   :  { %43 = vadd.xlane.f32.xlu0 %v42_v6  ;;  %v47_v11 = vadd.f32 %v46_v10, %v45_v9  ;;  %v146_v22 = vmul.f32 4.0, %v348_v18  ;;  %vm150_vm2 = vweird.f32 %v348_v18  ;;  %v350_v45 = vpop.eup %349 }
   0xe   :  { %v52_v15 = vsub.f32 1.0, %v51_v14  ;;  %v173_v52 = vmul.f32 3.0, %v350_v45  ;;  %vm177_vm3 = vweird.f32 %v350_v45 }
   0xf   :  { %v147_v26 = vsub.f32 1.0, %v146_v22 }
  0x10   :  { %v53_v17 = vmul.f32 %v346_v13, %v52_v15  ;;  %v174_v62 = vsub.f32 1.0, %v173_v52 }
  0x11   :  { %v148_v31 = vmul.f32 %v348_v18, %v147_v26 }
  0x12   :  { %v54_v19 = vadd.f32 %v346_v13, %v53_v17  ;;  %v175_v4 = vmul.f32 %v350_v45, %v174_v62 }
  0x13   :  { %v149_v38 = vadd.f32 %v348_v18, %v148_v31 }
  0x14   :  { %v56_v23 = vsel %vm55_vm1, %v346_v13, %v54_v19  ;;  %v176_v14 = vadd.f32 %v350_v45, %v175_v4 }
  0x15   :  { %48 = vadd.xlane.f32.xlu0 %v47_v11  ;;  %v151_v46 = vsel %vm150_vm2, %v348_v18, %v149_v38 }
  0x16   :  { %v178_v20 = vsel %vm177_vm3, %v350_v45, %v176_v14 }
  0x80   :  { %v44_v25 = vpop.xlane.xlu0 %43 }
  0x81   :  { %v57_v27 = vmul.f32 %v56_v23, %v44_v25 }
  0x83   :  { %v64_v28 = vperm.slane %v57_v27, %v439_v24  ;;  %v131_v29 = vsel %vm39_vm0, %v57_v27, 0.0 }
  0x84   :  { %v132_v30 = vrot.slane %v131_v29, 4 }
  0x85   :  { %v443_v32 = vsub.f32 %v18_v0, %v64_v28 }
  0x86   :  { %v133_v33 = vadd.f32 %v132_v30, %v131_v29 }
  0x87   :  { %v73_v35 = vmul.f32 %v443_v32, %v443_v32 }
  0x88   :  { %v134_v36 = vrot.slane %v133_v33, 2  ;;  %v49_v37 = vpop.xlane.xlu0 %48 }
  0x89   :  { %77 = vst [vmem:[#allocation1] ss:$2 sm:$0xff] %v73_v35  ;;  %v58_v39 = vmul.f32 %v56_v23, %v49_v37 }
  0x8a   :  { %v135_v40 = vadd.f32 %v134_v36, %v133_v33 }
  0x8b   :  { %v68_v41 = vperm.slane %v58_v39, %v439_v24  ;;  %v138_v42 = vsel %vm39_vm0, %v58_v39, 0.0 }
  0x8c   :  { %v136_v43 = vrot.slane %v135_v40, 1  ;;  %v139_v44 = vrot.slane %v138_v42, 4 }
  0x8d   :  { %v449_v47 = vsub.f32 %v19_v1, %v68_v41 }
  0x8e   :  { %v137_v48 = vadd.f32 %v136_v43, %v135_v40  ;;  %v140_v49 = vadd.f32 %v139_v44, %v138_v42 }
  0x8f   :  { %v74_v51 = vmul.f32 %v449_v47, %v449_v47 }
  0x90   :  { %v152_v53 = vmul.f32 %v151_v46, %v137_v48  ;;  %v141_v54 = vrot.slane %v140_v49, 2  ;;  %v78_v55 = vld.sshfl [vmem:[#allocation1] sm:$0xff pattern:$0x75316420] }
  0x91   :  { %81 = vst [vmem:[#allocation1 + $0x10] ss:$2 sm:$0xff] %v74_v51  ;;  %v79_v56 = vld.sshfl [vmem:[#allocation1 + $0x8] sm:$0xff pattern:$0x75316420]  ;;  %v88_v57 = vsel %vm39_vm0, %v78_v55, 0.0 }
  0x92   :  { %v454_v58 = vsub.f32 %v57_v27, %v152_v53  ;;  %v142_v59 = vadd.f32 %v141_v54, %v140_v49  ;;  %v89_v60 = vsel %vm39_vm0, %v79_v56, 0.0 }
  0x93   :  { %v90_v61 = vadd.f32 %v89_v60, %v88_v57 }
  0x94   :  { %v156_v63 = vmul.f32 %v454_v58, %v454_v58  ;;  %v143_v0 = vrot.slane %v142_v59, 1 }
  0x95   :  { %91 = vadd.xlane.f32.xlu1 %v90_v61  ;;  %v24_v61 = vld [vmem:[%s499_s3] sm:$0xf] }
  0x96   :  { %v158_v1 = vsel %vm39_vm0, %v156_v63, 0.0  ;;  %v144_v2 = vadd.f32 %v143_v0, %v142_v59 }
  0x97   :  { %v159_v3 = vrot.slane %v158_v1, 4 }
  0x98   :  { %v153_v5 = vmul.f32 %v151_v46, %v144_v2  ;;  %v82_v6 = vld.sshfl [vmem:[#allocation1 + $0x10] sm:$0xff pattern:$0x75316420]  ;;  %v83_v7 = vld.sshfl [vmem:[#allocation1 + $0x18] sm:$0xff pattern:$0x75316420] }
  0x99   :  { %v160_v8 = vadd.f32 %v159_v3, %v158_v1  ;;  %v93_v9 = vsel %vm39_vm0, %v82_v6, 0.0  ;;  %v94_v10 = vsel %vm39_vm0, %v83_v7, 0.0  ;;  %v237_v1 = vmul.f32 %v454_v58, %v24_v61  ;;  %v22_v3 = vld [vmem:[%s498_s2] sm:$0xf] }
  0x9a   :  { %v462_v11 = vsub.f32 %v58_v39, %v153_v5  ;;  %v95_v12 = vadd.f32 %v94_v10, %v93_v9 }
  0x9b   :  { %v161_v13 = vrot.slane %v160_v8, 2 }
  0x9c   :  { %v157_v15 = vmul.f32 %v462_v11, %v462_v11 }
  0x9d   :  { %v162_v16 = vadd.f32 %v161_v13, %v160_v8  ;;  %96 = vadd.xlane.f32.xlu1 %v95_v12  ;;  %v25_v13 = vld [vmem:[%s499_s3 + $0x4] sm:$0xf] }
  0x9e   :  { %v165_v17 = vsel %vm39_vm0, %v157_v15, 0.0  ;;  %v238_v15 = vmul.f32 %v462_v11, %v25_v13  ;;  %v21_v13 = vld [vmem:[%s497_s1 + $0x4] sm:$0xf] }
  0x9f   :  { %v163_v18 = vrot.slane %v162_v16, 1  ;;  %v166_v19 = vrot.slane %v165_v17, 4 }
  0xa1   :  { %v164_v21 = vadd.f32 %v163_v18, %v162_v16  ;;  %v167_v22 = vadd.f32 %v166_v19, %v165_v17  ;;  %v23_v17 = vld [vmem:[%s498_s2 + $0x4] sm:$0xf] }
  0xa3   :  { %v179_v23 = vmul.f32 %v178_v20, %v164_v21  ;;  %v168_v25 = vrot.slane %v167_v22, 2  ;;  %v400_v21 = vmov 255.0  }
  0xa5   :  { %351 = vrsqrt.f32 %v179_v23  ;;  %v169_v26 = vadd.f32 %v168_v25, %v167_v22  ;;  %vm188_vm4 = vcmp.eq.f32.partialorder %v179_v23, inf  ;;  %v191_v41 = vand.u32 2147483648, %v179_v23 }
  0xa6   :  { %vm190_vm5 = vcmp.eq.f32.partialorder %v179_v23, 0.0 }
  0xa7   :  { %v170_v27 = vrot.slane %v169_v26, 1 }
  0xa9   :  { %v171_v28 = vadd.f32 %v170_v27, %v169_v26 }
  0xab   :  { %v352_v29 = vpop.eup %351  ;;  %v180_v30 = vmul.f32 %v178_v20, %v171_v28 }
  0xac   :  { %v182_v31 = vmul.f32 %v352_v29, %v179_v23 }
  0xad   :  { %353 = vrsqrt.f32 %v180_v30  ;;  %vm200_vm6 = vcmp.eq.f32.partialorder %v180_v30, inf  ;;  %v203_v50 = vand.u32 2147483648, %v180_v30  ;;  %vm202_vm7 = vcmp.eq.f32.partialorder %v180_v30, 0.0 }
  0xae   :  { %v183_v33 = vmul.f32 %v352_v29, %v182_v31 }
  0xb0   :  { %v184_v34 = vmul.f32 0.5, %v183_v33 }
  0xb2   :  { %v185_v35 = vsub.f32 1.5, %v184_v34 }
  0xb3   :  { %v354_v36 = vpop.eup %353 }
  0xb4   :  { %v186_v37 = vmul.f32 %v352_v29, %v185_v35  ;;  %v194_v38 = vmul.f32 %v354_v36, %v180_v30 }
  0xb6   :  { %v187_v39 = vmul.f32 %v186_v37, %v179_v23  ;;  %v195_v40 = vmul.f32 %v354_v36, %v194_v38 }
  0xb8   :  { %v189_v42 = vsel %vm188_vm4, %v179_v23, %v187_v39  ;;  %v196_v43 = vmul.f32 0.5, %v195_v40 }
  0xb9   :  { %v192_v44 = vsel %vm190_vm5, %v191_v41, %v189_v42 }
  0xba   :  { %v239_v45 = vadd.f32 1e-06, %v192_v44  ;;  %v197_v46 = vsub.f32 1.5, %v196_v43 }
  0xbc   :  { %355 = vrcp.f32 %v239_v45  ;;  %v198_v48 = vmul.f32 %v354_v36, %v197_v46  ;;  %v252_v57 = vand.u32 2147483648, %v239_v45  ;;  %v250_v60 = vand.u32 2147483647, %v239_v45 }
  0xbd   :  { %vm246_vm9 = vweird.f32 %v239_v45 }
  0xbe   :  { %v199_v49 = vmul.f32 %v198_v48, %v180_v30  ;;  %v253_v63 = vor.u32 1.1754944e-38, %v252_v57  ;;  %vm251_vm11 = vcmp.eq.f32.partialorder %v250_v60, 8.507059e+37 }
  0xc0   :  { %v201_v51 = vsel %vm200_vm6, %v180_v30, %v199_v49 }
  0xc1   :  { %v204_v53 = vsel %vm202_vm7, %v203_v50, %v201_v51 }
  0xc2   :  { %v356_v52 = vpop.eup %355  ;;  %v240_v55 = vadd.f32 1e-06, %v204_v53 }
  0xc3   :  { %v242_v54 = vmul.f32 %v356_v52, %v239_v45  ;;  %vm247_vm8 = vweird.f32 %v356_v52 }
  0xc4   :  { %357 = vrcp.f32 %v240_v55  ;;  %vm248_vm10 = vmor %vm246_vm9, %vm247_vm8  ;;  %v267_v9 = vand.u32 2147483648, %v240_v55  ;;  %v265_v12 = vand.u32 2147483647, %v240_v55  ;;  %vm261_vm13 = vweird.f32 %v240_v55 }
  0xc5   :  { %v243_v56 = vsub.f32 1.0, %v242_v54  ;;  %359 = vrcp.f32 %v400_v21 }
  0xc6   :  { %v268_v14 = vor.u32 1.1754944e-38, %v267_v9  ;;  %vm266_vm15 = vcmp.eq.f32.partialorder %v265_v12, 8.507059e+37 }
  0xc7   :  { %v244_v59 = vmul.f32 %v356_v52, %v243_v56 }
  0xc9   :  { %v245_v62 = vadd.f32 %v356_v52, %v244_v59 }
  0xca   :  { %v358_v0 = vpop.eup %357 }
  0xcb   :  { %v249_v2 = vsel %vm248_vm10, %v356_v52, %v245_v62  ;;  %v257_v5 = vmul.f32 %v358_v0, %v240_v55  ;;  %vm262_vm12 = vweird.f32 %v358_v0  ;;  %v360_v22 = vpop.eup %359 }
  0xcc   :  { %v254_v4 = vsel %vm251_vm11, %v253_v63, %v249_v2  ;;  %vm263_vm14 = vmor %vm261_vm13, %vm262_vm12  ;;  %v99_v23 = vmul.f32 255.0, %v360_v22  ;;  %vm103_vm0 = vweird.f32 %v360_v22 }
  0xcd   :  { %v255_v6 = vmul.f32 %v254_v4, %v237_v1  ;;  %v258_v7 = vsub.f32 1.0, %v257_v5  ;;  %v20_v1 = vld [vmem:[%s497_s1] sm:$0xf]  ;;  %s401_s1 = smov [#allocation2]  }
  0xce   :  { %v100_v25 = vsub.f32 1.0, %v99_v23  ;;  %s319_s28 = sshll.u32 %s401_s1, 4  ;;  %s320_s28 = int_to_ptr.vmem [resolvable:$true] %s319_s28 }
  0xcf   :  { %v271_v8 = vadd.f32 %v255_v6, %v22_v3  ;;  %v259_v10 = vmul.f32 %v358_v0, %v258_v7 }
  0xd0   :  { %v101_v26 = vmul.f32 %v360_v22, %v100_v25 }
  0xd1   :  { %295 = vperm.xlu0 %343, %v271_v8   ;;  %v260_v58 = vadd.f32 %v358_v0, %v259_v10 }
  0xd2   :  { %v102_v27 = vadd.f32 %v360_v22, %v101_v26 }
  0xd3   :  { %v264_v16 = vsel %vm263_vm14, %v358_v0, %v260_v58 }
  0xd4   :  { %v269_v18 = vsel %vm266_vm15, %v268_v14, %v264_v16  ;;  %v104_v28 = vsel %vm103_vm0, %v360_v22, %v102_v27 }
  0xd5   :  { %v270_v19 = vmul.f32 %v269_v18, %v238_v15 }
  0xd7   :  { %v272_v20 = vadd.f32 %v270_v19, %v23_v17 }
  0xd9   :  { %299 = vperm.xlu1 %344, %v272_v20  }
 0x108   :  { %v92_v11 = vpop.xlane.xlu1 %91 }
 0x109   :  { %v105_v29 = vmul.f32 %v104_v28, %v92_v11 }
 0x10b   :  { %361 = vrsqrt.f32 %v105_v29  ;;  %vm114_vm1 = vcmp.eq.f32.partialorder %v105_v29, inf  ;;  %v117_v43 = vand.u32 2147483648, %v105_v29  ;;  %vm116_vm2 = vcmp.eq.f32.partialorder %v105_v29, 0.0 }
 0x110   :  { %v97_v30 = vpop.xlane.xlu1 %96 }
 0x111   :  { %v362_v31 = vpop.eup %361  ;;  %v106_v33 = vmul.f32 %v104_v28, %v97_v30 }
 0x112   :  { %v108_v34 = vmul.f32 %v362_v31, %v105_v29 }
 0x113   :  { %363 = vrsqrt.f32 %v106_v33  ;;  %vm126_vm3 = vcmp.eq.f32.partialorder %v106_v33, inf  ;;  %v129_v52 = vand.u32 2147483648, %v106_v33  ;;  %vm128_vm4 = vcmp.eq.f32.partialorder %v106_v33, 0.0 }
 0x114   :  { %v109_v35 = vmul.f32 %v362_v31, %v108_v34 }
 0x116   :  { %v110_v36 = vmul.f32 0.5, %v109_v35 }
 0x118   :  { %v111_v37 = vsub.f32 1.5, %v110_v36 }
 0x119   :  { %v364_v38 = vpop.eup %363 }
 0x11a   :  { %v120_v39 = vmul.f32 %v364_v38, %v106_v33  ;;  %v112_v40 = vmul.f32 %v362_v31, %v111_v37 }
 0x11c   :  { %v121_v41 = vmul.f32 %v364_v38, %v120_v39  ;;  %v113_v42 = vmul.f32 %v112_v40, %v105_v29 }
 0x11e   :  { %v122_v44 = vmul.f32 0.5, %v121_v41  ;;  %v115_v45 = vsel %vm114_vm1, %v105_v29, %v113_v42 }
 0x11f   :  { %v118_v46 = vsel %vm116_vm2, %v117_v43, %v115_v45 }
 0x120   :  { %v123_v48 = vsub.f32 1.5, %v122_v44  ;;  %v205_v49 = vadd.f32 1e-06, %v118_v46 }
 0x122   :  { %v124_v50 = vmul.f32 %v364_v38, %v123_v48  ;;  %365 = vrcp.f32 %v205_v49  ;;  %v218_v60 = vand.u32 2147483648, %v205_v49  ;;  %v216_v62 = vand.u32 2147483647, %v205_v49 }
 0x123   :  { %vm212_vm6 = vweird.f32 %v205_v49 }
 0x124   :  { %v125_v51 = vmul.f32 %v124_v50, %v106_v33  ;;  %v219_v2 = vor.u32 1.1754944e-38, %v218_v60  ;;  %vm217_vm8 = vcmp.eq.f32.partialorder %v216_v62, 8.507059e+37 }
 0x126   :  { %v127_v53 = vsel %vm126_vm3, %v106_v33, %v125_v51 }
 0x127   :  { %v130_v54 = vsel %vm128_vm4, %v129_v52, %v127_v53 }
 0x128   :  { %v366_v55 = vpop.eup %365  ;;  %v206_v56 = vadd.f32 1e-06, %v130_v54 }
 0x129   :  { %v208_v57 = vmul.f32 %v366_v55, %v205_v49  ;;  %vm213_vm5 = vweird.f32 %v366_v55 }
 0x12a   :  { %367 = vrcp.f32 %v206_v56  ;;  %vm214_vm7 = vmor %vm212_vm6, %vm213_vm5  ;;  %v233_v8 = vand.u32 2147483648, %v206_v56  ;;  %v231_v10 = vand.u32 2147483647, %v206_v56  ;;  %vm227_vm10 = vweird.f32 %v206_v56 }
 0x12b   :  { %v209_v59 = vsub.f32 1.0, %v208_v57 }
 0x12c   :  { %v234_v58 = vor.u32 1.1754944e-38, %v233_v8  ;;  %vm232_vm12 = vcmp.eq.f32.partialorder %v231_v10, 8.507059e+37 }
 0x12d   :  { %v210_v61 = vmul.f32 %v366_v55, %v209_v59 }
 0x12f   :  { %v211_v63 = vadd.f32 %v366_v55, %v210_v61 }
 0x130   :  { %v368_v0 = vpop.eup %367 }
 0x131   :  { %v215_v3 = vsel %vm214_vm7, %v366_v55, %v211_v63  ;;  %v223_v4 = vmul.f32 %v368_v0, %v206_v56  ;;  %vm228_vm9 = vweird.f32 %v368_v0 }
 0x132   :  { %v220_v5 = vsel %vm217_vm8, %v219_v2, %v215_v3  ;;  %vm229_vm11 = vmor %vm227_vm10, %vm228_vm9 }
 0x133   :  { %v221_v6 = vmul.f32 %v220_v5, %v20_v1  ;;  %v224_v7 = vsub.f32 1.0, %v223_v4 }
 0x135   :  { %275 = vperm.xlu2 %342, %v221_v6   ;;  %v225_v9 = vmul.f32 %v368_v0, %v224_v7 }
 0x137   :  { %v226_v12 = vadd.f32 %v368_v0, %v225_v9 }
 0x139   :  { %v230_v14 = vsel %vm229_vm11, %v368_v0, %v226_v12 }
 0x13a   :  { %v235_v15 = vsel %vm232_vm12, %v234_v58, %v230_v14 }
 0x13b   :  { %v236_v16 = vmul.f32 %v235_v15, %v21_v13 }
 0x13d   :  { %279 = vperm.xlu2 %342, %v236_v16  }
 0x143   :  { %v296_v17 = vpop.permute.xlu0 %295 }
 0x144   :  { %v304_v20 = vperm.slane %v296_v17, %v439_v24 }
 0x14b   :  { %v300_v23 = vpop.permute.xlu1 %299 }
 0x14c   :  { %v308_v27 = vperm.slane %v300_v23, %v439_v24 }
 0x18f   :  { %v276_v18 = vpop.permute.xlu2 %275 }
 0x190   :  { %v284_v19 = vperm.slane %v276_v18, %v439_v24 }
 0x192   :  { %v291_v21 = vmul.f32 %v284_v19, %v443_v32 }
 0x194   :  { %v311_v22 = vadd.f32 %v304_v20, %v291_v21 }
 0x196   :  { %313 = vst [vmem:[#allocation2] sm:$0xff] %v311_v22 }
 0x197   :  { %v280_v25 = vpop.permute.xlu2 %279 }
 0x198   :  { %v288_v26 = vperm.slane %v280_v25, %v439_v24 }
 0x19a   :  { %v292_v28 = vmul.f32 %v288_v26, %v449_v47 }
 0x19c   :  { %v312_v11 = vadd.f32 %v308_v27, %v292_v28 }
 0x19e   :  { %314 = vst [vmem:[#allocation2 + $0x8] sm:$0xff] %v312_v11 }
 0x19f   :  { %327 = dma.vmem_to_hbm [thread:$0]  %s320_s28, 256, %s322_s5, [#allocation3], %s402_s6, %s402_s6, %s403_s7  }
 0x1a0   :  { %393 = dma.done.wait [#allocation3], 256  }
 0x1a1   :  { %394 = vsyncadd [#allocation3], 4294967040 }
 0x1a2   :  { %332 = vsyncpa [#allocation3], 1 }

</bundles_post_ra>
